<compile_context>
chip_gen: v5e
topology: v5e:2x2
jax: 0.10.0
libtpu: 0.0.40
codegen_flags: <defaults>
</compile_context>

<pallas_src>
import math

import jax
import jax.numpy as jnp
from jax.experimental import pallas as pl
from jax.experimental.pallas import tpu as pltpu


# ----------------------------------------------------------------------------
# Kernels (elementwise; pe broadcasts over rows when its block has 1 row)
# ----------------------------------------------------------------------------
def _pe_eval_kernel(x_ref, pe_ref, o_ref):
    o_ref[...] = (x_ref[...] + pe_ref[...]).astype(o_ref.dtype)


def _pe_train_kernel(x_ref, pe_ref, m_ref, o_ref):
    # m_ref already holds 0 or 1/(1-p) in the output dtype (inverted dropout).
    o_ref[...] = ((x_ref[...] + pe_ref[...]) * m_ref[...]).astype(o_ref.dtype)


# ----------------------------------------------------------------------------
# PE table: squeezed [max_len, d_model] equivalent of the registered buffer.
# Built once in the model dtype (review: avoid a per-call cast round-trip).
# ----------------------------------------------------------------------------
def make_positional_encoding_table(d_model, max_len=5000, dtype=jnp.float32):
    position = jnp.arange(max_len, dtype=jnp.float32)[:, None]           # [L, 1]
    div_term = jnp.exp(
        jnp.arange(0, d_model, 2, dtype=jnp.float32) * (-math.log(10000.0) / d_model)
    )
    pe = jnp.zeros((max_len, d_model), dtype=jnp.float32)
    pe = pe.at[:, 0::2].set(jnp.sin(position * div_term))
    pe = pe.at[:, 1::2].set(jnp.cos(position * div_term)[:, : d_model // 2])
    return pe.astype(dtype)


def make_dropout_mask(key, shape, p, dtype):
    """Inverted-dropout mask: 0 with prob p, else 1/(1-p)."""
    if p <= 0.0:
        return jnp.ones(shape, dtype)
    if p >= 1.0:
        return jnp.zeros(shape, dtype)
    keep = jax.random.bernoulli(key, 1.0 - p, shape)
    return keep.astype(dtype) * jnp.asarray(1.0 / (1.0 - p), dtype)


# ----------------------------------------------------------------------------
# Generation-aware budgets
# ----------------------------------------------------------------------------
def _budgets():
    """(per-block byte budget, scoped vmem_limit_bytes)."""
    try:
        phys_vmem = int(pltpu.get_tpu_info().vmem_capacity_bytes)
    except Exception:
        phys_vmem = 64 * 1024 * 1024                 # conservative (v7x-sized)
    if phys_vmem >= 128 * 1024 * 1024:                # v5e / v6e
        return 6 * 1024 * 1024, 64 * 1024 * 1024
    return 4 * 1024 * 1024, 48 * 1024 * 1024          # v7x: 64 MiB physical VMEM


# ----------------------------------------------------------------------------
# Layout plan: fold sequence positions into the row dim when B < 8 so the
# vreg sublanes are filled, keeping the lane dim 128-aligned.
# ----------------------------------------------------------------------------
def _plan_layout(B, S, D):
    """Returns (rows, cols, s1).  s1 == 1 means plain (B, S*D) flattening;
    s1 > 1 means x -> (B*s1, (S//s1)*D) and pe[:S] -> (s1, (S//s1)*D), with
    one batch element per row tile so the PE block index ignores the row axis.
    """
    C = S * D
    if B >= 8:
        return B, C, 1
    for s1 in range(8, S + 1):                        # smallest valid -> widest lanes
        if S % s1:
            continue
        if (s1 % 8) and B > 1:                        # row tile must be sublane aligned
            continue
        if ((S // s1) * D) % 128:                     # lane dim must stay 128-aligned
            continue
        if s1 > 2048:                                 # keep the (s1, 128) floor block small
            continue
        return B * s1, (S // s1) * D, s1
    return B, C, 1


def _choose_tiles(num_rows, num_cols, itemsize, budget_bytes):
    budget_elems = max(1, budget_bytes // itemsize)
    # Don't reserve 8 rows of budget when the whole row extent is < 8.
    row_quantum = num_rows if num_rows < 8 else 8
    if num_cols % 128 == 0:
        max_cols = max(128, ((budget_elems // max(1, row_quantum)) // 128) * 128)
        t_cols = min(num_cols, max_cols)
    else:
        t_cols = num_cols             # wrapper pads, so this only hits tiny C
    rows_budget = max(1, budget_elems // t_cols)
    if rows_budget >= num_rows:
        t_rows = num_rows
    else:
        t_rows = min(num_rows, max(8, (rows_budget // 8) * 8))
    return t_rows, t_cols


# ----------------------------------------------------------------------------
# Forward
# ----------------------------------------------------------------------------
def positional_encoding_forward(x, pe, *, dropout_p=0.1, training=False, rng_key=None):
    """x: [B, S, D]; pe: [max_len, D] (ideally precomputed in x.dtype)."""
    B, S, D = x.shape
    dtype = x.dtype
    itemsize = jnp.dtype(dtype).itemsize

    rows, cols, s1 = _plan_layout(B, S, D)
    x2 = x.reshape(rows, cols)
    pe2 = pe[:S].astype(dtype).reshape(-1, cols)      # (1, cols) or (s1, cols)
    pe_rows = pe2.shape[0]

    use_dropout = training and dropout_p > 0.0
    mask2 = None
    if use_dropout:
        if rng_key is None:
            rng_key = jax.random.PRNGKey(0)
        mask2 = make_dropout_mask(rng_key, (B, S, D), dropout_p, dtype).reshape(rows, cols)

    # Pad the lane dim to a multiple of 128 -> unmasked lane-dense stores.
    pad = (-cols) % 128
    cols_p = cols + pad
    if pad:
        x2 = jnp.pad(x2, ((0, 0), (0, pad)))
        pe2 = jnp.pad(pe2, ((0, 0), (0, pad)))
        if mask2 is not None:
            mask2 = jnp.pad(mask2, ((0, 0), (0, pad)))

    budget_bytes, vmem_limit = _budgets()
    if s1 > 1:
        t_rows = s1                                   # one batch element per row block
        budget_elems = max(1, budget_bytes // itemsize)
        t_cols = min(cols_p, max(128, ((budget_elems // t_rows) // 128) * 128))
    else:
        t_rows, t_cols = _choose_tiles(rows, cols_p, itemsize, budget_bytes)

    # v7x has 2 TensorCores: make sure a big problem has >= 2 parallel blocks.
    if (pl.cdiv(rows, t_rows) * pl.cdiv(cols_p, t_cols) == 1
            and rows * cols_p * itemsize > (2 << 20) and t_cols >= 256):
        t_cols = max(128, ((t_cols // 2) // 128) * 128)

    # Column tiles outer, row tiles INNER -> pe block index (0, j) is constant
    # across the inner loop, so the PE slab stays resident in VMEM.
    grid = (pl.cdiv(cols_p, t_cols), pl.cdiv(rows, t_rows))

    x_spec = pl.BlockSpec((t_rows, t_cols), lambda j, i: (i, j))
    pe_spec = pl.BlockSpec((pe_rows, t_cols), lambda j, i: (0, j))
    out_spec = pl.BlockSpec((t_rows, t_cols), lambda j, i: (i, j))

    compiler_params = pltpu.CompilerParams(
        dimension_semantics=("parallel", "parallel"),
        vmem_limit_bytes=vmem_limit,
    )

    if use_dropout:
        kernel = _pe_train_kernel
        in_specs = [x_spec, pe_spec,
                    pl.BlockSpec((t_rows, t_cols), lambda j, i: (i, j))]
        operands = (x2, pe2, mask2)
    else:
        kernel = _pe_eval_kernel
        in_specs = [x_spec, pe_spec]
        operands = (x2, pe2)

    out2 = pl.pallas_call(
        kernel,
        out_shape=jax.ShapeDtypeStruct((rows, cols_p), dtype),
        grid_spec=pltpu.PrefetchScalarGridSpec(
            num_scalar_prefetch=0,
            grid=grid,
            in_specs=in_specs,
            out_specs=out_spec,
        ),
        compiler_params=compiler_params,
    )(*operands)

    if pad:
        out2 = out2[:, :cols]
    return out2.reshape(B, S, D)


if __name__ == "__main__":
    key = jax.random.PRNGKey(0)
    k_x1, k_x2, k_x3, k_drop = jax.random.split(key, 4)
    MAX_LEN = 64

    # --- Case 1: eval mode, [batch, seq, emb] small (plain (B, S*D) path) ---
    B, S, D = 2, 8, 32
    x = jax.random.normal(k_x1, (B, S, D), dtype=jnp.float32)
    pe = make_positional_encoding_table(D, max_len=MAX_LEN, dtype=jnp.float32)
    out = jax.block_until_ready(
        positional_encoding_forward(x, pe, dropout_p=0.1, training=False))
    ref = x + pe[:S][None, :, :]
    assert out.shape == (B, S, D)
    assert jnp.allclose(out, ref, atol=1e-6), "eval (flat path) mismatch"

    # --- Case 2: eval mode, shape exercising the sublane-fold path ----------
    B2, S2, D2 = 2, 32, 64
    x_b = jax.random.normal(k_x2, (B2, S2, D2), dtype=jnp.float32)
    pe_b = make_positional_encoding_table(D2, max_len=MAX_LEN, dtype=jnp.float32)
    out_b = jax.block_until_ready(positional_encoding_forward(x_b, pe_b, training=False))
    ref_b = x_b + pe_b[:S2][None, :, :]
    assert jnp.allclose(out_b, ref_b, atol=1e-6), "eval (folded path) mismatch"

    # --- Case 3: eval mode, unaligned embedding dim (lane-padding path) -----
    B3, S3, D3 = 2, 8, 20
    x_c = jax.random.normal(k_x3, (B3, S3, D3), dtype=jnp.float32)
    pe_c = make_positional_encoding_table(D3, max_len=MAX_LEN, dtype=jnp.float32)
    out_c = jax.block_until_ready(positional_encoding_forward(x_c, pe_c, training=False))
    ref_c = x_c + pe_c[:S3][None, :, :]
    assert jnp.allclose(out_c, ref_c, atol=1e-6), "eval (padded path) mismatch"

    # --- Case 4: training mode (inverted dropout applied in-kernel) ---------
    p = 0.1
    out_tr = jax.block_until_ready(
        positional_encoding_forward(x, pe, dropout_p=p, training=True, rng_key=k_drop))
    mask = make_dropout_mask(k_drop, (B, S, D), p, x.dtype)
    ref_tr = (x + pe[:S][None, :, :]) * mask
    assert out_tr.shape == (B, S, D)
    assert jnp.allclose(out_tr, ref_tr, atol=1e-6), "training-mode mismatch"

    print("KERNEL_OK")
</pallas_src>

<mosaic_0001>
module attributes {stable_mosaic.version = 11 : i64} {
  func.func @_pe_eval_kernel(%arg0: i32, %arg1: i32, %arg2: memref<2x256xf32, #tpu.memory_space<vmem>>, %arg3: memref<1x256xf32, #tpu.memory_space<vmem>>, %arg4: memref<2x256xf32, #tpu.memory_space<vmem>>) attributes {dimension_semantics = [#tpu.dimension_semantics<parallel>, #tpu.dimension_semantics<parallel>], iteration_bounds = array<i64: 1, 1>, scalar_prefetch = 0 : i64, scratch_operands = 0 : i64, tpu.core_type = #tpu.core_type<tc>, window_params = [{transform_indices = @transform_0, window_bounds = array<i64: 2, 256>}, {transform_indices = @transform_1, window_bounds = array<i64: 1, 256>}, {transform_indices = @transform_2, window_bounds = array<i64: 2, 256>}]} {
    %c0 = arith.constant 0 : index
    %c0_0 = arith.constant 0 : index
    %0 = vector.load %arg2[%c0, %c0_0] : memref<2x256xf32, #tpu.memory_space<vmem>>, vector<2x256xf32>
    %c0_1 = arith.constant 0 : index
    %c0_2 = arith.constant 0 : index
    %1 = vector.load %arg3[%c0_1, %c0_2] : memref<1x256xf32, #tpu.memory_space<vmem>>, vector<1x256xf32>
    %2 = vector.broadcast %1 : vector<1x256xf32> to vector<2x256xf32>
    %3 = arith.addf %0, %2 : vector<2x256xf32>
    %c0_3 = arith.constant 0 : index
    %c0_4 = arith.constant 0 : index
    %4 = vector.load %arg4[%c0_3, %c0_4] : memref<2x256xf32, #tpu.memory_space<vmem>>, vector<2x256xf32>
    tpu.vector_store %arg4[%c0_3, %c0_4], %3 {strides = array<i32>} : memref<2x256xf32, #tpu.memory_space<vmem>>, vector<2x256xf32>,
    return
  }
  func.func @transform_0(%arg0: i32, %arg1: i32) -> (i32, i32) {
    %c0_i32 = arith.constant 0 : i32
    return %arg1, %arg0 : i32, i32
  }
  func.func @transform_1(%arg0: i32, %arg1: i32) -> (i32, i32) {
    %c0_i32 = arith.constant 0 : i32
    %c0_i32_0 = arith.constant 0 : i32
    return %c0_i32, %arg0 : i32, i32
  }
  func.func @transform_2(%arg0: i32, %arg1: i32) -> (i32, i32) {
    %c0_i32 = arith.constant 0 : i32
    return %arg1, %arg0 : i32, i32
  }
}

</mosaic_0001>

<bundles_post_ra>
// kernel: tpu_custom_call.1
= control target key start
LH: loop header
LB: loop body
LE: loop exit
PB: predicated region body
PF: predicated region fallthrough
CT: control target
= control target key end

     0   :  { %7 = vsyncpa [#allocation3], 0  ;;  %s177_s0 = inlined_call_operand.hbm [shape: f32[2,256], index: 0, kind: input, shape index: {}]   ;;  %s178_s1 = inlined_call_operand.hbm [shape: f32[1,256], index: 1, kind: input, shape index: {}]   ;;  %s179_s2 = inlined_call_operand.hbm [shape: f32[2,256], index: 2, kind: output, shape index: {}]  }
   0x1   :  { %8 = vsyncpa [#allocation6], 0 }
   0x2   :  { %9 = vsyncpa [#allocation4], 0  ;;  %s15_s11 = sshll.u32 %s177_s0, 4  ;;  %s150_s12 = smov [#allocation2]   ;;  %s16_s11 = int_to_ptr.hbm [resolvable:$true] %s15_s11 }
   0x3   :  { %s17_s13 = sshll.u32 %s150_s12, 4  ;;  %s26_s16 = sshll.u32 %s178_s1, 4  ;;  %s18_s13 = int_to_ptr.vmem [resolvable:$true] %s17_s13  ;;  %s27_s16 = int_to_ptr.hbm [resolvable:$true] %s26_s16 }
   0x4   :  { %20 = dma.hbm_to_vmem [thread:$0]  %s16_s11, 64, %s18_s13, [#allocation3]  }
   0x5   :  { %s151_s17 = smov [#allocation5]  }
   0x6   :  { %s28_s18 = sshll.u32 %s151_s17, 4  ;;  %s29_s18 = int_to_ptr.vmem [resolvable:$true] %s28_s18 }
   0x7   :  { %31 = dma.hbm_to_vmem [thread:$0]  %s27_s16, 32, %s29_s18, [#allocation6]  }
   0x8   :  { %144 = dma.done.wait [#allocation3], 64  }
   0x9   :  { %145 = vsyncadd [#allocation3], 4294967232 }
   0xa   :  { %146 = dma.done.wait [#allocation6], 32  }
   0xb   :  { %147 = vsyncadd [#allocation6], 4294967264  ;;  %v41_v0 = vld [vmem:[#allocation5] sm:$0x3]  ;;  %vm46_vm0 = vcmask 1041408   ;;  %s152_s0 = smov [#allocation7]  }
   0xc   :  { %v43_v1 = vperm.slane %v41_v0, 0  ;;  %v44_v2 = vperm.slane %v41_v0, 1  ;;  %v40_v3 = vld [vmem:[#allocation2] sm:$0xf]  ;;  %s56_s19 = sshll.u32 %s152_s0, 4  ;;  %s58_s21 = sshll.u32 %s179_s2, 4  ;;  %s57_s19 = int_to_ptr.vmem [resolvable:$true] %s56_s19  ;;  %s59_s21 = int_to_ptr.hbm [resolvable:$true] %s58_s21 }
   0xe   :  { %v45_v4 = vrot.slane %v44_v2, 6 }
  0x10   :  { %v47_v5 = vsel %vm46_vm0, %v43_v1, %v45_v4 }
  0x11   :  { %v49_v6 = vadd.f32 %v47_v5, %v40_v3 }
  0x13   :  { %50 = vst [vmem:[#allocation7] sm:$0xf] %v49_v6 }
  0x14   :  { %61 = dma.vmem_to_hbm [thread:$0]  %s57_s19, 64, %s59_s21, [#allocation4]  }
  0x15   :  { %148 = dma.done.wait [#allocation4], 64  }
  0x16   :  { %149 = vsyncadd [#allocation4], 4294967232 }
  0x17   :  { %66 = vsyncpa [#allocation3], 1 }
  0x18   :  { %67 = vsyncpa [#allocation6], 1 }
  0x19   :  { %68 = vsyncpa [#allocation4], 1 }

</bundles_post_ra>
